<compile_context>
chip_gen: v7x
topology: tpu7x:2x2x1
jax: 0.10.0
libtpu: 0.0.40
codegen_flags: <defaults>
</compile_context>

<pallas_src>
import jax
import jax.numpy as jnp
from jax.experimental import pallas as pl
from jax.experimental.pallas import tpu as pltpu


def _round_up(x, m):
    return ((x + m - 1) // m) * m


def _cdiv(a, b):
    return (a + b - 1) // b


# ----------------------------------------------------------------------------
# Fused kernel: in-VMEM im2col + conv3x3 (BN folded) + ReLU + block-diag 1x1.
# ----------------------------------------------------------------------------
def _make_kernel(width, head_offsets):
    def kernel(x_ref, halo_ref, mask_ref, w1_ref, b1_ref, w2_ref, b2_ref,
               cell_ref, state_ref, disp_ref):
        # x_ref:    (1, 32, T)  bf16  flat padded input, lanes [t*T, t*T+T)
        # halo_ref: (1, 32, Th) bf16  lanes [(t+1)*T, (t+1)*T+Th)
        # mask_ref: (2, T)      bf16  {0,1} column masks (left / right border)
        # w1_ref:   (96, 288)   bf16  BN-scale-folded 3x3 weights (all heads)
        # b1_ref:   (96, 1)     f32   folded conv-bias + BN bias
        # w2_ref:   (M2, 96)    bf16  block-diagonal 1x1 weights, 8-aligned rows
        # b2_ref:   (M2, 1)     f32
        # outputs:  (1, co, T)  f32   one per head, lane-dense
        t_lanes = x_ref.shape[2]
        xcat = jnp.concatenate([x_ref[0], halo_ref[0]], axis=1)   # (32, T+Th)
        keep_l = mask_ref[0:1, :]                                  # (1, T)
        keep_r = mask_ref[1:2, :]

        segs = []
        for dy in range(3):
            for dx in range(3):
                off = dy * width + dx                      # static lane shift
                seg = xcat[:, off:off + t_lanes]           # (32, T)
                if dx == 0:
                    seg = seg * keep_l     # zero contributions past left edge
                elif dx == 2:
                    seg = seg * keep_r     # zero contributions past right edge
                segs.append(seg)
        patches = jnp.concatenate(segs, axis=0)            # (288, T) bf16

        h = jnp.dot(w1_ref[...], patches,
                    preferred_element_type=jnp.float32)    # (96, T) f32
        h = jnp.maximum(h + b1_ref[...], 0.0).astype(jnp.bfloat16)
        y = jnp.dot(w2_ref[...], h,
                    preferred_element_type=jnp.float32) + b2_ref[...]

        o_cell, o_state, o_disp = head_offsets
        cell_ref[0] = y[o_cell:o_cell + cell_ref.shape[1]].astype(cell_ref.dtype)
        state_ref[0] = y[o_state:o_state + state_ref.shape[1]].astype(state_ref.dtype)
        disp_ref[0] = y[o_disp:o_disp + disp_ref.shape[1]].astype(disp_ref.dtype)

    return kernel


def _choose_tiles(hw, w, n_batch, target=8192):
    """Pick (tile, halo, chunks): tile is a multiple of the halo size."""
    th = _round_up(2 * w + 2, 128)                               # halo lanes
    t = max(th, min(_round_up(hw, th), (target // th) * th))
    if n_batch * _cdiv(hw, t) < 2 and t > th:                    # >=2 units (v7x)
        t = max(th, _round_up(_cdiv(hw, 2), th))
    return t, th, _cdiv(hw, t)


def _fused_forward(x_nchw, w1, b1, w2, b2, couts, head_offsets):
    """x_nchw: (N, 32, H, W) f32. Returns three (N, co, HWp) f32 arrays."""
    n, c, h, w = x_nchw.shape
    assert c == 32
    hw = h * w
    t_lanes, th, chunks = _choose_tiles(hw, w, n)
    hwp = chunks * t_lanes           # padded flat output length (mult of 128)
    lp = hwp + th                    # padded flat input length
    lead = w + 1                     # lead zeros => tap index = q + dy*W + dx
    ratio = t_lanes // th

    xb = x_nchw.astype(jnp.bfloat16).reshape(n, c, hw)
    xflat = jnp.pad(xb, ((0, 0), (0, 0), (lead, lp - lead - hw)))

    col = jnp.arange(hwp, dtype=jnp.int32) % w
    masks = jnp.stack([(col != 0), (col != w - 1)]).astype(jnp.bfloat16)

    c_cell, c_state, c_disp = couts
    kernel = _make_kernel(w, head_offsets)

    outs = pl.pallas_call(
        kernel,
        out_shape=(jax.ShapeDtypeStruct((n, c_cell, hwp), jnp.float32),
                   jax.ShapeDtypeStruct((n, c_state, hwp), jnp.float32),
                   jax.ShapeDtypeStruct((n, c_disp, hwp), jnp.float32)),
        grid_spec=pltpu.PrefetchScalarGridSpec(
            num_scalar_prefetch=0,
            grid=(n, chunks),
            in_specs=[
                pl.BlockSpec((1, c, t_lanes), lambda b, t: (b, 0, t)),
                pl.BlockSpec((1, c, th), lambda b, t: (b, 0, (t + 1) * ratio)),
                pl.BlockSpec((2, t_lanes), lambda b, t: (0, t)),
                pl.BlockSpec(w1.shape, lambda b, t: (0, 0)),
                pl.BlockSpec(b1.shape, lambda b, t: (0, 0)),
                pl.BlockSpec(w2.shape, lambda b, t: (0, 0)),
                pl.BlockSpec(b2.shape, lambda b, t: (0, 0)),
            ],
            out_specs=(
                pl.BlockSpec((1, c_cell, t_lanes), lambda b, t: (b, 0, t)),
                pl.BlockSpec((1, c_state, t_lanes), lambda b, t: (b, 0, t)),
                pl.BlockSpec((1, c_disp, t_lanes), lambda b, t: (b, 0, t)),
            ),
        ),
        compiler_params=pltpu.CompilerParams(
            dimension_semantics=("parallel", "parallel"),
            vmem_limit_bytes=48 * 1024 * 1024),
    )(xflat, xflat, masks, w1, b1, w2, b2)

    if hwp != hw:
        outs = tuple(o[:, :, :hw] for o in outs)
    return outs


# ----------------------------------------------------------------------------
# Parameter construction (deterministic, synthetic), BN folding and packing.
# ----------------------------------------------------------------------------
def _make_head_params(key, cout2, eps=1e-5):
    c = 32
    ks = jax.random.split(key, 8)
    return dict(
        w1=0.1 * jax.random.normal(ks[0], (c, c, 3, 3), jnp.float32),  # OIHW
        b1=0.1 * jax.random.normal(ks[1], (c,), jnp.float32),
        gamma=1.0 + 0.1 * jax.random.normal(ks[2], (c,), jnp.float32),
        beta=0.1 * jax.random.normal(ks[3], (c,), jnp.float32),
        mean=0.1 * jax.random.normal(ks[4], (c,), jnp.float32),
        var=jax.random.uniform(ks[5], (c,), jnp.float32, 0.5, 1.5),
        w2=0.1 * jax.random.normal(ks[6], (cout2, c), jnp.float32),    # (O, I)
        b2=0.1 * jax.random.normal(ks[7], (cout2,), jnp.float32),
        eps=eps)


def _pack_heads(heads):
    """Fold BN (eval stats) into the 3x3 weights and pack fused operands."""
    c = 32
    w1_rows, b1s, couts, offs = [], [], [], []
    row = 0
    for p in heads:
        scale = p['gamma'] / jnp.sqrt(p['var'] + p['eps'])          # (32,)
        bias = p['beta'] + (p['b1'] - p['mean']) * scale            # (32,)
        # (co, ci, ky, kx) -> (co, ky, kx, ci) -> (32, 288); col = tap*32 + ci
        w1r = jnp.transpose(p['w1'], (0, 2, 3, 1)).reshape(c, 9 * c)
        w1_rows.append(w1r * scale[:, None])      # fold BN scale pre-bf16 cast
        b1s.append(bias)
        couts.append(p['w2'].shape[0])
        offs.append(row)
        row += max(8, _round_up(p['w2'].shape[0], 8))
    m2 = row

    w1 = jnp.concatenate(w1_rows, axis=0)                     # (96, 288)
    b1 = jnp.concatenate(b1s).reshape(-1, 1)                  # (96, 1)
    w2 = jnp.zeros((m2, c * len(heads)), jnp.float32)         # block-diagonal
    b2 = jnp.zeros((m2, 1), jnp.float32)
    for i, p in enumerate(heads):
        o, n_out = offs[i], couts[i]
        w2 = w2.at[o:o + n_out, i * c:(i + 1) * c].set(p['w2'])
        b2 = b2.at[o:o + n_out, 0].set(p['b2'])
    return (w1.astype(jnp.bfloat16), b1, w2.astype(jnp.bfloat16), b2,
            tuple(couts), tuple(offs))


# ----------------------------------------------------------------------------
# Pure-JAX reference (lax.conv, HIGHEST precision) for one head, NCHW.
# ----------------------------------------------------------------------------
def _ref_head(x_nchw, p):
    y = jax.lax.conv_general_dilated(
        x_nchw, p['w1'], (1, 1), 'SAME',
        dimension_numbers=('NCHW', 'OIHW', 'NCHW'),
        precision=jax.lax.Precision.HIGHEST) + p['b1'][None, :, None, None]
    inv = (p['gamma'] / jnp.sqrt(p['var'] + p['eps']))[None, :, None, None]
    y = (y - p['mean'][None, :, None, None]) * inv + p['beta'][None, :, None, None]
    y = jnp.maximum(y, 0.0)
    y = jnp.einsum('nchw,oc->nohw', y, p['w2'],
                   precision=jax.lax.Precision.HIGHEST)
    return y + p['b2'][None, :, None, None]


# ----------------------------------------------------------------------------
# MotionNetMGDA (JAX / Pallas)
# ----------------------------------------------------------------------------
class MotionNetMGDAPallas:
    def __init__(self, key, out_seq_len=20, motion_category_num=2,
                 category_num=5):
        self.out_seq_len = out_seq_len
        k_cell, k_state, k_motion = jax.random.split(key, 3)
        self.cell = _make_head_params(k_cell, category_num)
        self.state = _make_head_params(k_state, motion_category_num)
        self.motion = _make_head_params(k_motion, 2 * out_seq_len)
        (self.w1, self.b1, self.w2, self.b2, self.couts,
         self.offs) = _pack_heads([self.cell, self.state, self.motion])

    def __call__(self, stpn_out_nchw):
        x = stpn_out_nchw.astype(jnp.float32)
        n, _, h, w = x.shape
        cell, state, disp = _fused_forward(x, self.w1, self.b1, self.w2,
                                           self.b2, self.couts, self.offs)
        cell = cell.reshape(n, self.couts[0], h, w)
        state = state.reshape(n, self.couts[1], h, w)
        disp = disp.reshape(-1, 2, h, w)     # matches torch .view(-1, 2, H, W)
        return disp, cell, state

    def reference(self, stpn_out_nchw):
        x = stpn_out_nchw.astype(jnp.float32)
        h, w = x.shape[2], x.shape[3]
        cell = _ref_head(x, self.cell)
        state = _ref_head(x, self.state)
        disp = _ref_head(x, self.motion).reshape(-1, 2, h, w)
        return disp, cell, state


if __name__ == "__main__":
    key = jax.random.PRNGKey(0)
    k_params, k_input = jax.random.split(key)

    N, C, H, W = 2, 32, 16, 16            # stpn_out must have 32 channels
    out_seq_len = 8
    stpn_out = jax.random.normal(k_input, (N, C, H, W), jnp.float32)

    model = MotionNetMGDAPallas(k_params, out_seq_len=out_seq_len,
                                motion_category_num=2, category_num=5)

    fwd = jax.jit(model.__call__)
    disp, cell_pred, state_pred = fwd(stpn_out)
    jax.block_until_ready((disp, cell_pred, state_pred))

    # Shape checks (match torch semantics).
    assert disp.shape == (N * out_seq_len, 2, H, W), disp.shape
    assert cell_pred.shape == (N, 5, H, W), cell_pred.shape
    assert state_pred.shape == (N, 2, H, W), state_pred.shape

    # Numerical check against the pure-JAX (HIGHEST-precision) reference.
    # Kernel uses bf16 MXU inputs (both matmuls) with f32 accumulation.
    disp_r, cell_r, state_r = model.reference(stpn_out)
    for got, want in ((disp, disp_r), (cell_pred, cell_r),
                      (state_pred, state_r)):
        assert jnp.allclose(got, want, rtol=4e-2, atol=4e-2), \
            float(jnp.max(jnp.abs(got - want)))

    print("KERNEL_OK")
</pallas_src>

<mosaic_0001>
module attributes {stable_mosaic.version = 11 : i64} {
  func.func @kernel(%arg0: i32, %arg1: i32, %arg2: memref<1x32x256xbf16, #tpu.memory_space<vmem>>, %arg3: memref<1x32x128xbf16, #tpu.memory_space<vmem>>, %arg4: memref<2x256xbf16, #tpu.memory_space<vmem>>, %arg5: memref<96x288xbf16, #tpu.memory_space<vmem>>, %arg6: memref<96x1xf32, #tpu.memory_space<vmem>>, %arg7: memref<32x96xbf16, #tpu.memory_space<vmem>>, %arg8: memref<32x1xf32, #tpu.memory_space<vmem>>, %arg9: memref<1x5x256xf32, #tpu.memory_space<vmem>>, %arg10: memref<1x2x256xf32, #tpu.memory_space<vmem>>, %arg11: memref<1x16x256xf32, #tpu.memory_space<vmem>>) attributes {dimension_semantics = [#tpu.dimension_semantics<parallel>, #tpu.dimension_semantics<parallel>], iteration_bounds = array<i64: 2, 1>, scalar_prefetch = 0 : i64, scratch_operands = 0 : i64, tpu.core_type = #tpu.core_type<tc>, window_params = [{transform_indices = @transform_0, window_bounds = array<i64: 1, 32, 256>}, {transform_indices = @transform_1, window_bounds = array<i64: 1, 32, 128>}, {transform_indices = @transform_2, window_bounds = array<i64: 2, 256>}, {pipeline_mode = #tpu.pipeline_mode<synchronous>, transform_indices = @transform_3, window_bounds = array<i64: 96, 288>}, {pipeline_mode = #tpu.pipeline_mode<synchronous>, transform_indices = @transform_4, window_bounds = array<i64: 96, 1>}, {pipeline_mode = #tpu.pipeline_mode<synchronous>, transform_indices = @transform_5, window_bounds = array<i64: 32, 96>}, {pipeline_mode = #tpu.pipeline_mode<synchronous>, transform_indices = @transform_6, window_bounds = array<i64: 32, 1>}, {transform_indices = @transform_7, window_bounds = array<i64: 1, 5, 256>}, {transform_indices = @transform_8, window_bounds = array<i64: 1, 2, 256>}, {transform_indices = @transform_9, window_bounds = array<i64: 1, 16, 256>}]} {
    %c0 = arith.constant 0 : index
    %c0_0 = arith.constant 0 : index
    %c0_1 = arith.constant 0 : index
    %0 = vector.load %arg2[%c0, %c0_0, %c0_1] : memref<1x32x256xbf16, #tpu.memory_space<vmem>>, vector<1x32x256xbf16>
    %1 = vector.shape_cast %0 : vector<1x32x256xbf16> to vector<32x256xbf16>
    %c0_2 = arith.constant 0 : index
    %c0_3 = arith.constant 0 : index
    %c0_4 = arith.constant 0 : index
    %2 = vector.load %arg3[%c0_2, %c0_3, %c0_4] : memref<1x32x128xbf16, #tpu.memory_space<vmem>>, vector<1x32x128xbf16>
    %3 = vector.shape_cast %2 : vector<1x32x128xbf16> to vector<32x128xbf16>
    %4 = tpu.concatenate %1, %3 in 1 : vector<32x256xbf16>, vector<32x128xbf16> -> vector<32x384xbf16>
    %c0_5 = arith.constant 0 : index
    %c0_6 = arith.constant 0 : index
    %5 = vector.load %arg4[%c0_5, %c0_6] : memref<2x256xbf16, #tpu.memory_space<vmem>>, vector<1x256xbf16>
    %c1 = arith.constant 1 : index
    %c0_7 = arith.constant 0 : index
    %6 = vector.load %arg4[%c1, %c0_7] : memref<2x256xbf16, #tpu.memory_space<vmem>>, vector<1x256xbf16>
    %7 = vector.extract_strided_slice %4 {offsets = [0, 0], sizes = [32, 256], strides = [1, 1]} : vector<32x384xbf16> to vector<32x256xbf16>
    %8 = vector.broadcast %5 : vector<1x256xbf16> to vector<32x256xbf16>
    %9 = arith.mulf %7, %8 : vector<32x256xbf16>
    %10 = vector.extract_strided_slice %4 {offsets = [0, 1], sizes = [32, 256], strides = [1, 1]} : vector<32x384xbf16> to vector<32x256xbf16>
    %11 = vector.extract_strided_slice %4 {offsets = [0, 2], sizes = [32, 256], strides = [1, 1]} : vector<32x384xbf16> to vector<32x256xbf16>
    %12 = vector.broadcast %6 : vector<1x256xbf16> to vector<32x256xbf16>
    %13 = arith.mulf %11, %12 : vector<32x256xbf16>
    %14 = vector.extract_strided_slice %4 {offsets = [0, 16], sizes = [32, 256], strides = [1, 1]} : vector<32x384xbf16> to vector<32x256xbf16>
    %15 = vector.broadcast %5 : vector<1x256xbf16> to vector<32x256xbf16>
    %16 = arith.mulf %14, %15 : vector<32x256xbf16>
    %17 = vector.extract_strided_slice %4 {offsets = [0, 17], sizes = [32, 256], strides = [1, 1]} : vector<32x384xbf16> to vector<32x256xbf16>
    %18 = vector.extract_strided_slice %4 {offsets = [0, 18], sizes = [32, 256], strides = [1, 1]} : vector<32x384xbf16> to vector<32x256xbf16>
    %19 = vector.broadcast %6 : vector<1x256xbf16> to vector<32x256xbf16>
    %20 = arith.mulf %18, %19 : vector<32x256xbf16>
    %21 = vector.extract_strided_slice %4 {offsets = [0, 32], sizes = [32, 256], strides = [1, 1]} : vector<32x384xbf16> to vector<32x256xbf16>
    %22 = vector.broadcast %5 : vector<1x256xbf16> to vector<32x256xbf16>
    %23 = arith.mulf %21, %22 : vector<32x256xbf16>
    %24 = vector.extract_strided_slice %4 {offsets = [0, 33], sizes = [32, 256], strides = [1, 1]} : vector<32x384xbf16> to vector<32x256xbf16>
    %25 = vector.extract_strided_slice %4 {offsets = [0, 34], sizes = [32, 256], strides = [1, 1]} : vector<32x384xbf16> to vector<32x256xbf16>
    %26 = vector.broadcast %6 : vector<1x256xbf16> to vector<32x256xbf16>
    %27 = arith.mulf %25, %26 : vector<32x256xbf16>
    %28 = tpu.concatenate %9, %10, %13, %16, %17, %20, %23, %24, %27 in 0 : vector<32x256xbf16>, vector<32x256xbf16>, vector<32x256xbf16>, vector<32x256xbf16>, vector<32x256xbf16>, vector<32x256xbf16>, vector<32x256xbf16>, vector<32x256xbf16>, vector<32x256xbf16> -> vector<288x256xbf16>
    %c0_8 = arith.constant 0 : index
    %c0_9 = arith.constant 0 : index
    %29 = vector.load %arg5[%c0_8, %c0_9] : memref<96x288xbf16, #tpu.memory_space<vmem>>, vector<96x288xbf16>
    %cst = arith.constant dense<0.000000e+00> : vector<96x256xf32>
    %30 = tpu.matmul %29, %28, %cst {dimension_numbers = #tpu.dot_dimension_numbers<[1], [0], [0], [1], [0, 0, 1, 1], [], []>} : vector<96x288xbf16>, vector<288x256xbf16>, vector<96x256xf32> -> vector<96x256xf32>
    %c0_10 = arith.constant 0 : index
    %c0_11 = arith.constant 0 : index
    %31 = vector.load %arg6[%c0_10, %c0_11] : memref<96x1xf32, #tpu.memory_space<vmem>>, vector<96x1xf32>
    %32 = vector.broadcast %31 : vector<96x1xf32> to vector<96x256xf32>
    %33 = arith.addf %30, %32 : vector<96x256xf32>
    %cst_12 = arith.constant 0.000000e+00 : f32
    %34 = vector.broadcast %cst_12 : f32 to vector<96x256xf32>
    %35 = arith.maximumf %33, %34 : vector<96x256xf32>
    %36 = arith.truncf %35 : vector<96x256xf32> to vector<96x256xbf16>
    %c0_13 = arith.constant 0 : index
    %c0_14 = arith.constant 0 : index
    %37 = vector.load %arg7[%c0_13, %c0_14] : memref<32x96xbf16, #tpu.memory_space<vmem>>, vector<32x96xbf16>
    %cst_15 = arith.constant dense<0.000000e+00> : vector<32x256xf32>
    %38 = tpu.matmul %37, %36, %cst_15 {dimension_numbers = #tpu.dot_dimension_numbers<[1], [0], [0], [1], [0, 0, 1, 1], [], []>} : vector<32x96xbf16>, vector<96x256xbf16>, vector<32x256xf32> -> vector<32x256xf32>
    %c0_16 = arith.constant 0 : index
    %c0_17 = arith.constant 0 : index
    %39 = vector.load %arg8[%c0_16, %c0_17] : memref<32x1xf32, #tpu.memory_space<vmem>>, vector<32x1xf32>
    %40 = vector.broadcast %39 : vector<32x1xf32> to vector<32x256xf32>
    %41 = arith.addf %38, %40 : vector<32x256xf32>
    %42 = vector.extract_strided_slice %41 {offsets = [0, 0], sizes = [5, 256], strides = [1, 1]} : vector<32x256xf32> to vector<5x256xf32>
    %c0_18 = arith.constant 0 : index
    %c0_19 = arith.constant 0 : index
    %c0_20 = arith.constant 0 : index
    %43 = vector.load %arg9[%c0_18, %c0_19, %c0_20] : memref<1x5x256xf32, #tpu.memory_space<vmem>>, vector<1x5x256xf32>
    %44 = vector.shape_cast %43 : vector<1x5x256xf32> to vector<5x256xf32>
    %45 = vector.shape_cast %42 : vector<5x256xf32> to vector<1x5x256xf32>
    tpu.vector_store %arg9[%c0_18, %c0_19, %c0_20], %45 {strides = array<i32>} : memref<1x5x256xf32, #tpu.memory_space<vmem>>, vector<1x5x256xf32>,
    %46 = vector.extract_strided_slice %41 {offsets = [8, 0], sizes = [2, 256], strides = [1, 1]} : vector<32x256xf32> to vector<2x256xf32>
    %c0_21 = arith.constant 0 : index
    %c0_22 = arith.constant 0 : index
    %c0_23 = arith.constant 0 : index
    %47 = vector.load %arg10[%c0_21, %c0_22, %c0_23] : memref<1x2x256xf32, #tpu.memory_space<vmem>>, vector<1x2x256xf32>
    %48 = vector.shape_cast %47 : vector<1x2x256xf32> to vector<2x256xf32>
    %49 = vector.shape_cast %46 : vector<2x256xf32> to vector<1x2x256xf32>
    tpu.vector_store %arg10[%c0_21, %c0_22, %c0_23], %49 {strides = array<i32>} : memref<1x2x256xf32, #tpu.memory_space<vmem>>, vector<1x2x256xf32>,
    %50 = vector.extract_strided_slice %41 {offsets = [16, 0], sizes = [16, 256], strides = [1, 1]} : vector<32x256xf32> to vector<16x256xf32>
    %c0_24 = arith.constant 0 : index
    %c0_25 = arith.constant 0 : index
    %c0_26 = arith.constant 0 : index
    %51 = vector.load %arg11[%c0_24, %c0_25, %c0_26] : memref<1x16x256xf32, #tpu.memory_space<vmem>>, vector<1x16x256xf32>
    %52 = vector.shape_cast %51 : vector<1x16x256xf32> to vector<16x256xf32>
    %53 = vector.shape_cast %50 : vector<16x256xf32> to vector<1x16x256xf32>
    tpu.vector_store %arg11[%c0_24, %c0_25, %c0_26], %53 {strides = array<i32>} : memref<1x16x256xf32, #tpu.memory_space<vmem>>, vector<1x16x256xf32>,
    return
  }
  func.func @transform_0(%arg0: i32, %arg1: i32) -> (i32, i32, i32) {
    %c0_i32 = arith.constant 0 : i32
    %c0_i32_0 = arith.constant 0 : i32
    return %arg0, %c0_i32, %arg1 : i32, i32, i32
  }
  func.func @transform_1(%arg0: i32, %arg1: i32) -> (i32, i32, i32) {
    %c1_i32 = arith.constant 1 : i32
    %0 = arith.addi %arg1, %c1_i32 : i32
    %c2_i32 = arith.constant 2 : i32
    %1 = arith.muli %0, %c2_i32 : i32
    %c0_i32 = arith.constant 0 : i32
    %c0_i32_0 = arith.constant 0 : i32
    return %arg0, %c0_i32, %1 : i32, i32, i32
  }
  func.func @transform_2(%arg0: i32, %arg1: i32) -> (i32, i32) {
    %c0_i32 = arith.constant 0 : i32
    %c0_i32_0 = arith.constant 0 : i32
    return %c0_i32, %arg1 : i32, i32
  }
  func.func @transform_3(%arg0: i32, %arg1: i32) -> (i32, i32) {
    %c0_i32 = arith.constant 0 : i32
    %c0_i32_0 = arith.constant 0 : i32
    %c0_i32_1 = arith.constant 0 : i32
    return %c0_i32, %c0_i32_0 : i32, i32
  }
  func.func @transform_4(%arg0: i32, %arg1: i32) -> (i32, i32) {
    %c0_i32 = arith.constant 0 : i32
    %c0_i32_0 = arith.constant 0 : i32
    %c0_i32_1 = arith.constant 0 : i32
    return %c0_i32, %c0_i32_0 : i32, i32
  }
  func.func @transform_5(%arg0: i32, %arg1: i32) -> (i32, i32) {
    %c0_i32 = arith.constant 0 : i32
    %c0_i32_0 = arith.constant 0 : i32
    %c0_i32_1 = arith.constant 0 : i32
    return %c0_i32, %c0_i32_0 : i32, i32
  }
  func.func @transform_6(%arg0: i32, %arg1: i32) -> (i32, i32) {
    %c0_i32 = arith.constant 0 : i32
    %c0_i32_0 = arith.constant 0 : i32
    %c0_i32_1 = arith.constant 0 : i32
    return %c0_i32, %c0_i32_0 : i32, i32
  }
  func.func @transform_7(%arg0: i32, %arg1: i32) -> (i32, i32, i32) {
    %c0_i32 = arith.constant 0 : i32
    %c0_i32_0 = arith.constant 0 : i32
    return %arg0, %c0_i32, %arg1 : i32, i32, i32
  }
  func.func @transform_8(%arg0: i32, %arg1: i32) -> (i32, i32, i32) {
    %c0_i32 = arith.constant 0 : i32
    %c0_i32_0 = arith.constant 0 : i32
    return %arg0, %c0_i32, %arg1 : i32, i32, i32
  }
  func.func @transform_9(%arg0: i32, %arg1: i32) -> (i32, i32, i32) {
    %c0_i32 = arith.constant 0 : i32
    %c0_i32_0 = arith.constant 0 : i32
    return %arg0, %c0_i32, %arg1 : i32, i32, i32
  }
}

</mosaic_0001>

<bundles_post_ra>
// kernel: a_call__.1
= control target key start
LH: loop header
LB: loop body
LE: loop exit
PB: predicated region body
PF: predicated region fallthrough
CT: control target
= control target key end

     0   :  { %s2544_s30 = smov 0   ;;  %s2546_s10 = smov 0   ;;  %s2908_s0 = inlined_call_operand.vmem [shape: bf16[2,32,384], index: 0, kind: input, shape index: {}, may-alias: {0,1}]   ;;  %s2909_s1 = inlined_call_operand.vmem [shape: bf16[2,32,384], index: 1, kind: input, shape index: {}, may-alias: {0,1}]   ;;  %s2910_s2 = inlined_call_operand.vmem [shape: bf16[2,256], index: 2, kind: input, shape index: {}]   ;;  %s2911_s3 = inlined_call_operand.vmem [shape: bf16[96,288], index: 3, kind: input, shape index: {}]   ;;  %s2912_s4 = inlined_call_operand.vmem [shape: f32[96,1], index: 4, kind: input, shape index: {}]   ;;  %s2913_s5 = inlined_call_operand.vmem [shape: bf16[32,96], index: 5, kind: input, shape index: {}]   ;;  %s2914_s6 = inlined_call_operand.vmem [shape: f32[32,1], index: 6, kind: input, shape index: {}]   ;;  %s2915_s7 = inlined_call_operand.vmem [shape: f32[2,5,256], index: 7, kind: output, shape index: {0}]   ;;  %s2916_s8 = inlined_call_operand.vmem [shape: f32[2,2,256], index: 8, kind: output, shape index: {1}]   ;;  %s2917_s9 = inlined_call_operand.vmem [shape: f32[2,16,256], index: 9, kind: output, shape index: {2}]  }
   0x1   :  { %s2548_s11 = smov 0   ;;  %s2550_s12 = smov 0  }
   0x2   :  { %s2552_s13 = smov 0  }
   0x3 LB: > { %s32_s14 = sadd.s32 1, %s2469_s12  ;;  %p48_p1 = scmp.ne.s32.totalorder %s2461_s10, %s2457_s30  ;;  %s2473_s13 = sphi %s2552_s13, %s20_s13   ;;  %s2469_s12 = sphi %s2550_s12, %s2922_s12   ;;  %s2465_s11 = sphi %s2548_s11, %s2921_s11   ;;  %s2461_s10 = sphi %s2546_s10, %s2920_s10   ;;  %s2457_s30 = sphi %s2544_s30, %s2919_s30  }
   0x4   : > { %p34_p0 = scmp.ge.s32.totalorder %s32_s14, 2  ;;  %p49_p2 = scmp.eq.s32.totalorder %s2473_s13, 0 }
   0x5   : > { %s41_s17 = sadd.s32 1, %s2461_s10  ;;  %p2176_p5 = scmp.ge.s32.totalorder %s2473_s13, 2 }
   0x6   : > { %s2924_s14 = smov (%p34_p0, %s32_s14), 0  ;;  %p2575_p3 = por %p49_p2, %p48_p1 }
   0x7   : > { %s36_s16 = ssub.s32 %s2469_s12, %s2924_s14  ;;  %320 = sbr.rel (%p2176_p5) target bundleno = 38 (0x26), region = 36 }
   0x8   : > { %p39_p4 = scmp.eq.s32.totalorder %s36_s16, 0 }
   0xa   : > { %s2583_s18 = scalar_select %p39_p4, %s2461_s10, %s41_s17  }
   0xe   : > { %323 = sbr.rel (!%p2575_p3) target bundleno = 31 (0x1f), region = 40  ;;  %s325_s19 = sand.u32 (%p2575_p3), 1, %s2461_s10  }
   0xf   : > { %s2295_s20 = smul.u32 (%p2575_p3), 48, %s2469_s12  ;;  %s2177_s21 = sshll.u32 (%p2575_p3), %s325_s19, 5 }
  0x10   : > { %s327_s25 = scalar_lea.vmem (%p2575_p3), [#allocation2], %s2177_s21   ;;  %s2475_s26 = smov (%p2575_p3), 0  }
  0x11   : > { %s337_s24 = scalar_lea.vmem (%p2575_p3), %s2908_s0, %s2295_s20  }
  0x15 LB: >> { %v539_v0 = vld [vmem:[%s337_s24] sm:$0xff]  ;;  %v541_v1 = vld [vmem:[%s337_s24 + $0xc] sm:$0xff]  ;;  %v543_v2 = vld [vmem:[%s337_s24 + $0x18] sm:$0xff]  ;;  %s533_s26 = sadd.s32 1, %s2477_s26   ;;  %s2477_s26 = sphi %s2475_s26, %s533_s26  }
  0x16   : >> { %540 = vst [vmem:[%s327_s25] sm:$0xff] %v539_v0  ;;  %542 = vst [vmem:[%s327_s25 + $0x8] sm:$0xff] %v541_v1  ;;  %v545_v3 = vld [vmem:[%s337_s24 + $0x24] sm:$0xff]  ;;  %p532_p6 = scmp.ge.s32.totalorder %s533_s26, 1 }
  0x17   : >> { %544 = vst [vmem:[%s327_s25 + $0x10] sm:$0xff] %v543_v2  ;;  %546 = vst [vmem:[%s327_s25 + $0x18] sm:$0xff] %v545_v3 }
  0x18   : > { %535 = sbr.rel (!%p532_p6) target bundleno = 21 (0x15), region = 254 }
  0x1f PF: > { %765 = sbr.rel (!%p2575_p3) target bundleno = 38 (0x26), region = 106  ;;  %s767_s27 = sand.u32 (%p2575_p3), 1, %s2461_s10  }
  0x20   : > { %s2192_s28 = smul.u32 (%p2575_p3), 48, %s2469_s12  ;;  %s2191_s29 = sshll.u32 (%p2575_p3), %s767_s27, 4 }
  0x21   : > { %s769_s20 = scalar_lea.vmem (%p2575_p3), [#allocation3], %s2191_s29 }
  0x22   : > { %s1982_s19 = scalar_lea.vmem (%p2575_p3), %s2909_s1, %s2192_s28 }
  0x23   : > { %v2193_v4 = vld [vmem:[%s1982_s19 + $0x8] sm:$0xf] (%p2575_p3)  ;;  %v2194_v5 = vld [vmem:[%s1982_s19 + $0x14] sm:$0xf] (%p2575_p3)  ;;  %v2195_v6 = vld [vmem:[%s1982_s19 + $0x20] sm:$0xf] (%p2575_p3) }
  0x24   : > { %792 = vst [vmem:[%s769_s20] sm:$0xf] (%p2575_p3), %v2193_v4  ;;  %794 = vst [vmem:[%s769_s20 + $0x4] sm:$0xf] (%p2575_p3), %v2194_v5  ;;  %v2196_v7 = vld [vmem:[%s1982_s19 + $0x2c] sm:$0xf] (%p2575_p3) }
  0x25   : > { %796 = vst [vmem:[%s769_s20 + $0x8] sm:$0xf] (%p2575_p3), %v2195_v6  ;;  %798 = vst [vmem:[%s769_s20 + $0xc] sm:$0xf] (%p2575_p3), %v2196_v7 }
  0x26 PF: > { %p2197_p7 = scmp.ge.s32.totalorder %s2473_s13, 1  ;;  %p828_p8 = scmp.lt.s32.totalorder %s2473_s13, 3 }
  0x28   : > { %p829_p9 = pnand %p2197_p7, %p828_p8 }
  0x29   : > { %v2212_v8 = vld.sshfl [vmem:[%s2910_s2] sm:$0x11 pattern:$0x75316420] (!%p829_p9)  ;;  %v1003_v9 = vlaneseq (!%p829_p9)  ;;  %v2479_v10 = vmov (!%p829_p9), 1966171168  }
  0x2a   : > { %832 = sbr.rel (%p829_p9) target bundleno = 853 (0x355), region = 147  ;;  %v1001_v11 = vunpack.c.l.s4 (!%p829_p9), %v2479_v10  ;;  %v999_v14 = vcombine.high (!%p829_p9), %v2212_v8, %v2212_v8  ;;  %s835_s22 = sand.u32 (!%p829_p9), 1, %s2457_s30   ;;  %vm1069_vm0 = vcmask (!%p829_p9), 130048   ;;  %vm1052_vm1 = vcmask (!%p829_p9), 15360  }
  0x2b   : > { %v1004_v12 = vshrl.u32 (!%p829_p9), %v1003_v9, 7  ;;  %s2198_s23 = sshll.u32 (!%p829_p9), %s835_s22, 5  ;;  %s2606_s24 = sshll.u32 (!%p829_p9), %s835_s22, 4  ;;  %vm1137_vm2 = vcmask (!%p829_p9), 1039360   ;;  %vm1099_vm3 = vcmask (!%p829_p9), 261120   ;;  %vm1084_vm4 = vcmask (!%p829_p9), 146432  }
  0x2c   : > { %v1002_v13 = vunpack.c.0.s8 (!%p829_p9), %v1001_v11  ;;  %s2608_s25 = scalar_lea.vmem (!%p829_p9), [#allocation2], %s2198_s23  ;;  %s844_s26 = scalar_lea.vmem (!%p829_p9), [#allocation3], %s2606_s24  ;;  %vm1114_vm5 = vcmask (!%p829_p9), 277504   ;;  %vm1164_vm6 = vcmask (!%p829_p9), 1031168   ;;  %vm1191_vm7 = vcmask (!%p829_p9), 916480  }
  0x2d   : > { %v1019_v17 = vsub.s32 (!%p829_p9), 0, %v1004_v12  ;;  %s2480_s27 = smov (!%p829_p9), 16   ;;  %s2481_s30 = smov (!%p829_p9), 2   ;;  %v2613_v29 = vld [vmem:[%s844_s26] sm:$0xff] (!%p829_p9)   ;;  %v2633_v34 = vld [vmem:[%s844_s26 + $0x8] sm:$0xff] (!%p829_p9)   ;;  %vm1212_vm8 = vcmask (!%p829_p9), 908288  }
  0x2e   : > { %v1005_v15 = vsub.s32 (!%p829_p9), %v1002_v13, %v1004_v12  ;;  %s2482_s28 = smov (!%p829_p9), 32   ;;  %s2483_s29 = smov (!%p829_p9), 18   ;;  %v2616_v30 = vld [vmem:[%s2608_s25 + $0x4] ss:$8 sps:$4 sm:$0xff] (!%p829_p9)   ;;  %v2620_v31 = vld [vmem:[%s2608_s25 + $0x14] ss:$8 sps:$4 sm:$0xff] (!%p829_p9)  }
  0x2f   : > { %s2484_s16 = smov (!%p829_p9), 34   ;;  %s2485_s17 = smov (!%p829_p9), 127   ;;  %v2624_v32 = vld [vmem:[%s2608_s25] ss:$8 sps:$4 sm:$0xff] (!%p829_p9)   ;;  %v2628_v33 = vld [vmem:[%s2608_s25 + $0x10] ss:$8 sps:$4 sm:$0xff] (!%p829_p9)  }
  0x30   : > { %v1006_v16 = vrot.slane (!%p829_p9), %v2212_v8, %v1005_v15  ;;  %v1013_v18 = vrot.slane (!%p829_p9), %v999_v14, %v1005_v15  ;;  %s2486_s19 = smov (!%p829_p9), 111   ;;  %s2487_s20 = smov (!%p829_p9), 112   ;;  %vm1239_vm9 = vcmask (!%p829_p9), 900096   ;;  %vm1266_vm10 = vcmask (!%p829_p9), 785408  }
  0x31   : > { %s2488_s15 = smov 126   ;;  %s2489_s21 = smov 110   ;;  %vm1287_vm11 = vcmask 777216   ;;  %vm1314_vm12 = vcmask 769024  }
  0x32   : > { %v1015_v19 = vpack.i.b16 %v1006_v16, %v1006_v16  ;;  %v1022_v20 = vpack.i.b16 %v1013_v18, %v1013_v18  ;;  %v1032_v21 = vshrl.u32 %v1006_v16, 16  ;;  %v1039_v22 = vshrl.u32 %v1013_v18, 16  ;;  %s2490_s22 = smov 96   ;;  %s2491_s23 = smov 95  }
  0x33   : > { %s2492_s24 = smov 94   ;;  %p920_p10 = scmp.lt.s32.totalorder %s2465_s11, 1 }
  0x34   : > { %v1020_v23 = vrot.slane %v1015_v19, %v1019_v17  ;;  %v1033_v24 = vpack.i.b16 %v1032_v21, %v1032_v21  ;;  %v1040_v25 = vpack.i.b16 %v1039_v22, %v1039_v22  ;;  %v1027_v26 = vrot.slane %v1022_v20, %v1019_v17 }
  0x35   : > { %s2926_s11 = smov (!%p920_p10, %s2465_s11), 1 }
  0x36   : > { %1065 = vrot.lane.b32.xlu1 %v1020_v23, %s2480_s27  ;;  %v1038_v27 = vrot.slane %v1033_v24, %v1019_v17  ;;  %v1045_v28 = vrot.slane %v1040_v25, %v1019_v17  ;;  %v1029_v35 = vmul.bf16 %v2616_v30, %v1027_v26  ;;  %v1028_v36 = vmul.bf16 %v2624_v32, %v1020_v23  ;;  %v2395_v25 = vld [vmem:[%s2911_s3 + $0x4] ss:$12 sps:$4 sm:$0xff]   ;;  %s2245_s26 = sshll.u32 %s2926_s11, 2 }
  0x37   : > { %v1031_v37 = vmul.bf16 %v2620_v31, %v1027_v26  ;;  %v1030_v38 = vmul.bf16 %v2628_v33, %v1020_v23  ;;  %1560 = vmatprep.mubr.bf16.mxu0 %v2395_v25 }
  0x38   : > { %1048 = vrot.lane.b32.xlu0 %v1038_v27, %s2481_s30  ;;  %1528 = vmatprep.subr.bf16.mxu0 %v1029_v35 }
  0x39   : > { %1529 = vmatpush1.bf16.msra.mxu0 %v1028_v36 }
  0x3a   : > { %1067 = vrot.lane.b32.xlu1 %v1027_v26, %s2480_s27  ;;  %1530 = vmatprep.subr.bf16.mxu0 %v1031_v37 }
  0x3c   : > { %1050 = vrot.lane.b32.xlu0 %v1045_v28, %s2481_s30 }
  0x3d   : > { %1531 = vmatpush1.bf16.msra.mxu0 %v1030_v38  ;;  %v1348_v38 = vld [vmem:[%s2912_s4 + $0x8] sm:$0xff] }
  0x3e   : > { %1097 = vrot.lane.b32.xlu1 %v1027_v26, %s2482_s28 }
  0x40   : > { %1095 = vrot.lane.b32.xlu0 %v1020_v23, %s2482_s28  ;;  %s937_s28 = scalar_lea.vmem %s2916_s8, %s2245_s26 }
  0x42   : > { %1082 = vrot.lane.b32.xlu1 %v1045_v28, %s2483_s29 }
  0x44   : > { %1080 = vrot.lane.b32.xlu0 %v1038_v27, %s2483_s29  ;;  %s2246_s29 = sshll.u32 %s2926_s11, 5 }
  0x46   : > { %1112 = vrot.lane.b32.xlu1 %v1045_v28, %s2484_s16 }
  0x48   : > { %1110 = vrot.lane.b32.xlu0 %v1038_v27, %s2484_s16  ;;  %v2493_v27 = vmov 0  }
  0x49   : > { %1653 = vmatprep.mubr.bf16.mxu1 %v2493_v27  ;;  %2384 = vset.pattern.permute.xlu1 %v2493_v27 }
  0x4a   : > { %1129 = vrot.lane.b32.xlu1 %v2613_v29, %s2485_s17  ;;  %2383 = vset.pattern.permute.xlu0 %v2493_v27 }
  0x4c   : > { %1127 = vrot.lane.b32.xlu0 %v2616_v30, %s2485_s17 }
  0x4e   : > { %1133 = vrot.lane.b32.xlu1 %v2620_v31, %s2485_s17 }
  0x50   : > { %1125 = vrot.lane.b32.xlu0 %v2624_v32, %s2485_s17 }
  0x52   : > { %1131 = vrot.lane.b32.xlu1 %v2628_v33, %s2485_s17 }
  0x54   : > { %1135 = vrot.lane.b32.xlu0 %v2633_v34, %s2485_s17 }
  0x56   : > { %1204 = vrot.lane.b32.xlu1 %v2613_v29, %s2486_s19 }
  0x58   : > { %1202 = vrot.lane.b32.xlu0 %v2616_v30, %s2486_s19 }
  0x5a   : > { %1208 = vrot.lane.b32.xlu1 %v2620_v31, %s2486_s19 }
  0x5c   : > { %1200 = vrot.lane.b32.xlu0 %v2624_v32, %s2486_s19 }
  0x5e   : > { %1206 = vrot.lane.b32.xlu1 %v2628_v33, %s2486_s19 }
  0x60   : > { %1210 = vrot.lane.b32.xlu0 %v2633_v34, %s2486_s19  ;;  %s947_s19 = scalar_lea.vmem %s2917_s9, %s2246_s29 }
  0xa8   : > { %v1066_v39 = vpop.permute.xlu1 %1065 }
  0xa9   : > { %v1074_v40 = vmul.bf16 %v2624_v32, %v1066_v39  ;;  %v1077_v48 = vmul.bf16 %v2628_v33, %v1066_v39 }
  0xaa   : > { %v1049_v41 = vpop.permute.xlu0 %1048 }
  0xab   : > { %1179 = vrot.lane.b32.xlu0 %v1074_v40, %s2487_s20  ;;  %v1057_v51 = vmul.bf16 %v2624_v32, %v1049_v41  ;;  %v1060_v61 = vmul.bf16 %v2628_v33, %v1049_v41 }
  0xac   : > { %v1068_v42 = vpop.permute.xlu1 %1067 }
  0xad   : > { %v1076_v43 = vmul.bf16 %v2613_v29, %v1068_v42  ;;  %v1079_v44 = vmul.bf16 %v2633_v34, %v1068_v42  ;;  %v1070_v45 = vsel %vm1069_vm0, %v1066_v39, %v1068_v42  ;;  %v1352_v42 = vld [vmem:[%s2912_s4 + $0x28] sm:$0xff] }
  0xae   : > { %v1051_v46 = vpop.permute.xlu0 %1050  ;;  %v1075_v49 = vmul.bf16 %v2616_v30, %v1070_v45  ;;  %v1078_v53 = vmul.bf16 %v2620_v31, %v1070_v45 }
  0xaf   : > { %1183 = vrot.lane.b32.xlu1 %v1076_v43, %s2487_s20  ;;  %1189 = vrot.lane.b32.xlu0 %v1079_v44, %s2487_s20  ;;  %v1059_v55 = vmul.bf16 %v2613_v29, %v1051_v46  ;;  %v1062_v56 = vmul.bf16 %v2633_v34, %v1051_v46  ;;  %v1053_v58 = vsel %vm1052_vm1, %v1049_v41, %v1051_v46  ;;  %v1351_v41 = vld [vmem:[%s2912_s4 + $0x20] sm:$0xff]  ;;  %v1353_v43 = vld [vmem:[%s2912_s4 + $0x30] sm:$0xff] }
  0xb0   : > { %v2650_v47 = vpop.permute.xlu1 %1097  ;;  %v1058_v62 = vmul.bf16 %v2616_v30, %v1053_v58  ;;  %v1061_v8 = vmul.bf16 %v2620_v31, %v1053_v58  ;;  %v1354_v44 = vld [vmem:[%s2912_s4 + $0x38] sm:$0xff] }
  0xb1   : > { %v1106_v16 = vmul.bf16 %v2613_v29, %v2650_v47  ;;  %v1109_v17 = vmul.bf16 %v2633_v34, %v2650_v47 }
  0xb2   : > { %v2654_v50 = vpop.permute.xlu0 %1095 }
  0xb3   : > { %1185 = vrot.lane.b32.xlu1 %v1077_v48, %s2487_s20  ;;  %1181 = vrot.lane.b32.xlu0 %v1075_v49, %s2487_s20  ;;  %v1100_v9 = vsel %vm1099_vm3, %v2654_v50, %v2650_v47  ;;  %v1104_v15 = vmul.bf16 %v2624_v32, %v2654_v50  ;;  %v1107_v20 = vmul.bf16 %v2628_v33, %v2654_v50  ;;  %v1355_v47 = vld [vmem:[%s2912_s4 + $0x40] sm:$0xff]  ;;  %v1356_v48 = vld [vmem:[%s2912_s4 + $0x48] sm:$0xff] }
  0xb4   : > { %v1083_v52 = vpop.permute.xlu1 %1082  ;;  %v1105_v14 = vmul.bf16 %v2616_v30, %v1100_v9  ;;  %v1108_v18 = vmul.bf16 %v2620_v31, %v1100_v9 }
  0xb5   : > { %v1091_v1 = vmul.bf16 %v2613_v29, %v1083_v52  ;;  %v1094_v7 = vmul.bf16 %v2633_v34, %v1083_v52 }
  0xb6   : > { %v1081_v54 = vpop.permute.xlu0 %1080 }
  0xb7   : > { %1187 = vrot.lane.b32.xlu1 %v1078_v53, %s2487_s20  ;;  %1152 = vrot.lane.b32.xlu0 %v1057_v51, %s2488_s15  ;;  %v1089_v0 = vmul.bf16 %v2624_v32, %v1081_v54  ;;  %v1092_v13 = vmul.bf16 %v2628_v33, %v1081_v54  ;;  %v1085_v19 = vsel %vm1084_vm4, %v1081_v54, %v1083_v52  ;;  %v1357_v51 = vld [vmem:[%s2912_s4 + $0x50] sm:$0xff]  ;;  %v1358_v52 = vld [vmem:[%s2912_s4 + $0x58] sm:$0xff] }
  0xb8   : > { %v2661_v57 = vpop.permute.xlu1 %1112  ;;  %v1090_v21 = vmul.bf16 %v2616_v30, %v1085_v19  ;;  %v1093_v22 = vmul.bf16 %v2620_v31, %v1085_v19 }
  0xb9   : > { %v1121_v24 = vmul.bf16 %v2613_v29, %v2661_v57 }
  0xba   : > { %v2663_v59 = vpop.permute.xlu0 %1110 }
  0xbb   : > { %1156 = vrot.lane.b32.xlu1 %v1059_v55, %s2488_s15  ;;  %1162 = vrot.lane.b32.xlu0 %v1062_v56, %s2488_s15  ;;  %v1119_v23 = vmul.bf16 %v2624_v32, %v2663_v59  ;;  %v1115_v26 = vsel %vm1114_vm5, %v2663_v59, %v2661_v57  ;;  %v1122_v35 = vmul.bf16 %v2628_v33, %v2663_v59  ;;  %v1755_v55 = vld [vmem:[%s2914_s6 + $0x8] sm:$0xff]  ;;  %v1754_v56 = vld [vmem:[%s2914_s6] sm:$0xff] }
  0xbc   : > { %v1130_v60 = vpop.permute.xlu1 %1129  ;;  %v1120_v28 = vmul.bf16 %v2616_v30, %v1115_v26  ;;  %v1756_v59 = vld [vmem:[%s2914_s6 + $0x10] sm:$0xff] }
  0xbe   : > { %v1128_v63 = vpop.permute.xlu0 %1127 }
  0xbf   : > { %1158 = vrot.lane.b32.xlu1 %v1060_v61, %s2488_s15  ;;  %1154 = vrot.lane.b32.xlu0 %v1058_v62, %s2488_s15  ;;  %v1139_v2 = vsel %vm1137_vm2, %v1128_v63, %v1130_v60  ;;  %v1757_v60 = vld [vmem:[%s2914_s6 + $0x18] sm:$0xff] }
  0xc0   : > { %v1134_v3 = vpop.permute.xlu1 %1133  ;;  %1532 = vmatprep.subr.bf16.mxu0 %v1139_v2 }
  0xc2   : > { %v1126_v4 = vpop.permute.xlu0 %1125 }
  0xc3   : > { %1231 = vrot.lane.b32.xlu1 %v1091_v1, %s2489_s21  ;;  %1227 = vrot.lane.b32.xlu0 %v1089_v0, %s2489_s21  ;;  %v1138_v5 = vsel %vm1137_vm2, %v1126_v4, %v1128_v63 }
  0xc4   : > { %1533 = vmatpush1.bf16.msra.mxu0 %v1138_v5  ;;  %v1132_v6 = vpop.permute.xlu1 %1131 }
  0xc5   : > { %v1140_v11 = vsel %vm1137_vm2, %v1132_v6, %v1134_v3 }
  0xc6   : > { %v1136_v10 = vpop.permute.xlu0 %1135 }
  0xc7   : > { %1160 = vrot.lane.b32.xlu1 %v1061_v8, %s2488_s15  ;;  %1237 = vrot.lane.b32.xlu0 %v1094_v7, %s2489_s21  ;;  %v1141_v12 = vsel %vm1137_vm2, %v1134_v3, %v1136_v10 }
  0xc8   : > { %1534 = vmatprep.subr.bf16.mxu0 %v1141_v12  ;;  %v2728_v37 = vpop.permute.xlu1 %1204 }
  0xc9   : > { %1535 = vmatpush1.bf16.msra.mxu0 %v1140_v11 }
  0xca   : > { %v2726_v36 = vpop.permute.xlu0 %1202 }
  0xcb   : > { %1233 = vrot.lane.b32.xlu1 %v1092_v13, %s2489_s21  ;;  %1256 = vrot.lane.b32.xlu0 %v1105_v14, %s2490_s22 }
  0xcc   : > { %v2744_v39 = vpop.permute.xlu1 %1208 }
  0xcf   : > { %1258 = vrot.lane.b32.xlu1 %v1106_v16, %s2490_s22  ;;  %1254 = vrot.lane.b32.xlu0 %v1104_v15, %s2490_s22 }
  0xd0   : > { %v2760_v45 = vpop.permute.xlu1 %1206 }
  0xd3   : > { %1262 = vrot.lane.b32.xlu1 %v1108_v18, %s2490_s22  ;;  %1264 = vrot.lane.b32.xlu0 %v1109_v17, %s2490_s22  ;;  %v1214_v17 = vsel %vm1212_vm8, %v2726_v36, %v2728_v37 }
  0xd7   : > { %1260 = vrot.lane.b32.xlu1 %v1107_v20, %s2490_s22  ;;  %1229 = vrot.lane.b32.xlu0 %v1090_v21, %s2489_s21  ;;  %s2244_s22 = sshll.u32 %s2926_s11, 4 }
  0xd8   : > { %s927_s25 = scalar_lea.vmem %s2915_s7, %s2244_s22 }
  0xdb   : > { %1279 = vrot.lane.b32.xlu1 %v2613_v29, %s2491_s23  ;;  %1277 = vrot.lane.b32.xlu0 %v2616_v30, %s2491_s23  ;;  %v1124_v29 = vmul.bf16 %v2633_v34, %v2661_v57  ;;  %v2730_v30 = vpop.permute.xlu0 %1200 }
  0xdc   : > { %v1213_v20 = vsel %vm1212_vm8, %v2730_v30, %v2726_v36 }
  0xdf   : > { %1235 = vrot.lane.b32.xlu1 %v1093_v22, %s2489_s21  ;;  %1275 = vrot.lane.b32.xlu0 %v2624_v32, %s2491_s23  ;;  %v1123_v32 = vmul.bf16 %v2620_v31, %v1115_v26  ;;  %v2746_v40 = vpop.permute.xlu0 %1210 }
  0xe0   : > { %v1216_v21 = vsel %vm1212_vm8, %v2744_v39, %v2746_v40 }
  0xe3   : > { %1302 = vrot.lane.b32.xlu1 %v1119_v23, %s2492_s24  ;;  %1306 = vrot.lane.b32.xlu0 %v1121_v24, %s2492_s24  ;;  %v1215_v24 = vsel %vm1212_vm8, %v2760_v45, %v2744_v39 }
  0xe7   : > { %1285 = vrot.lane.b32.xlu1 %v2633_v34, %s2491_s23  ;;  %1283 = vrot.lane.b32.xlu0 %v2620_v31, %s2491_s23  ;;  %v1347_v31 = vld [vmem:[%s2912_s4] sm:$0xff]  ;;  %v1350_v34 = vld [vmem:[%s2912_s4 + $0x18] sm:$0xff] }
  0xeb   : > { %1304 = vrot.lane.b32.xlu1 %v1120_v28, %s2492_s24  ;;  %1281 = vrot.lane.b32.xlu0 %v2628_v33, %s2491_s23  ;;  %v1349_v33 = vld [vmem:[%s2912_s4 + $0x10] sm:$0xff] }
  0xef   : > { %1310 = vrot.lane.b32.xlu1 %v1123_v32, %s2492_s24  ;;  %1312 = vrot.lane.b32.xlu0 %v1124_v29, %s2492_s24 }
  0xf3   : > { %1308 = vrot.lane.b32.xlu1 %v1122_v35, %s2492_s24  ;;  %1361 = vperm.xlu0 %2383, %v1347_v31  }
  0xf7   : > { %1366 = vperm.xlu1 %2384, %v1348_v38   ;;  %1376 = vperm.xlu0 %2383, %v1350_v34  }
  0xfb   : > { %1371 = vperm.xlu1 %2384, %v1349_v33   ;;  %1386 = vperm.xlu0 %2383, %v1352_v42  }
  0xff   : > { %1381 = vperm.xlu1 %2384, %v1351_v41   ;;  %1396 = vperm.xlu0 %2383, %v1354_v44  }
 0x103   : > { %1391 = vperm.xlu1 %2384, %v1353_v43   ;;  %1406 = vperm.xlu0 %2383, %v1356_v48  }
 0x107   : > { %1401 = vperm.xlu1 %2384, %v1355_v47   ;;  %1416 = vperm.xlu0 %2383, %v1358_v52  }
 0x10b   : > { %1411 = vperm.xlu1 %2384, %v1357_v51   ;;  %1760 = vperm.xlu0 %2383, %v1754_v56  }
 0x10f   : > { %1765 = vperm.xlu1 %2384, %v1755_v55   ;;  %1775 = vperm.xlu0 %2383, %v1757_v60   ;;  %v2400_v60 = vld [vmem:[%s2911_s3 + $0x20] ss:$12 sps:$4 sm:$0xff]  }
 0x113   : > { %1770 = vperm.xlu1 %2384, %v1756_v59   ;;  %v2401_v59 = vld [vmem:[%s2911_s3 + $0x34] ss:$12 sps:$4 sm:$0xff]  }
 0x11d   : > { %v1180_v46 = vpop.permute.xlu0 %1179 }
 0x121   : > { %v1184_v49 = vpop.permute.xlu1 %1183  ;;  %v1190_v50 = vpop.permute.xlu0 %1189 }
 0x125   : > { %v1186_v53 = vpop.permute.xlu1 %1185  ;;  %v1182_v54 = vpop.permute.xlu0 %1181 }
 0x126   : > { %v1193_v9 = vsel %vm1191_vm7, %v1182_v54, %v1184_v49  ;;  %v1192_v12 = vsel %vm1191_vm7, %v1180_v46, %v1182_v54  ;;  %v2397_v54 = vld [vmem:[%s2911_s3 + $0x1c] ss:$12 sps:$4 sm:$0xff]  }
 0x129   : > { %v1188_v57 = vpop.permute.xlu1 %1187  ;;  %v1153_v58 = vpop.permute.xlu0 %1152 }
 0x12a   : > { %v1195_v13 = vsel %vm1191_vm7, %v1188_v57, %v1190_v50  ;;  %v1194_v16 = vsel %vm1191_vm7, %v1186_v53, %v1188_v57  ;;  %v2393_v53 = vld [vmem:[%s2911_s3] ss:$12 sps:$4 sm:$0xff]   ;;  %v2396_v57 = vld [vmem:[%s2911_s3 + $0x8] ss:$12 sps:$4 sm:$0xff]  }
 0x12d   : > { %v1157_v61 = vpop.permute.xlu1 %1156  ;;  %v1163_v62 = vpop.permute.xlu0 %1162 }
 0x131   : > { %v1159_v63 = vpop.permute.xlu1 %1158  ;;  %v1155_v0 = vpop.permute.xlu0 %1154 }
 0x132   : > { %v1166_v1 = vsel %vm1164_vm6, %v1155_v0, %v1157_v61  ;;  %v1165_v2 = vsel %vm1164_vm6, %v1153_v58, %v1155_v0  ;;  %v2399_v58 = vld [vmem:[%s2911_s3 + $0x18] ss:$12 sps:$4 sm:$0xff]   ;;  %v2403_v61 = vld [vmem:[%s2911_s3 + $0x30] ss:$12 sps:$4 sm:$0xff]   ;;  %v2407_v0 = vld [vmem:[%s2911_s3 + $0x48] ss:$12 sps:$4 sm:$0xff]  }
 0x133   : > { %1536 = vmatprep.subr.bf16.mxu0 %v1166_v1  ;;  %v2409_v1 = vld [vmem:[%s2911_s3 + $0x64] ss:$12 sps:$4 sm:$0xff]  }
 0x134   : > { %1537 = vmatpush1.bf16.msra.mxu0 %v1165_v2  ;;  %v2408_v2 = vld [vmem:[%s2911_s3 + $0x50] ss:$12 sps:$4 sm:$0xff]  }
 0x135   : > { %v1232_v3 = vpop.permute.xlu1 %1231  ;;  %v1228_v4 = vpop.permute.xlu0 %1227 }
 0x139   : > { %v1161_v5 = vpop.permute.xlu1 %1160  ;;  %v1238_v6 = vpop.permute.xlu0 %1237 }
 0x13a   : > { %v1168_v7 = vsel %vm1164_vm6, %v1161_v5, %v1163_v62  ;;  %v1167_v8 = vsel %vm1164_vm6, %v1159_v63, %v1161_v5  ;;  %v2405_v62 = vld [vmem:[%s2911_s3 + $0x4c] ss:$12 sps:$4 sm:$0xff]   ;;  %v2412_v5 = vld [vmem:[%s2911_s3 + $0x68] ss:$12 sps:$4 sm:$0xff]  }
 0x13b   : > { %1538 = vmatprep.subr.bf16.mxu0 %v1168_v7  ;;  %v2404_v63 = vld [vmem:[%s2911_s3 + $0x38] ss:$12 sps:$4 sm:$0xff]   ;;  %v2416_v7 = vld [vmem:[%s2911_s3 + $0x80] ss:$12 sps:$4 sm:$0xff]  }
 0x13c   : > { %1539 = vmatpush1.bf16.msra.mxu0 %v1167_v8 }
 0x13d   : > { %v1234_v10 = vpop.permute.xlu1 %1233  ;;  %v1257_v11 = vpop.permute.xlu0 %1256  ;;  %1540 = vmatprep.subr.bf16.mxu0 %v1193_v9 }
 0x140   : > { %1541 = vmatpush1.bf16.msra.mxu0 %v1192_v12 }
 0x141   : > { %v1259_v14 = vpop.permute.xlu1 %1258  ;;  %v1255_v15 = vpop.permute.xlu0 %1254  ;;  %1542 = vmatprep.subr.bf16.mxu0 %v1195_v13 }
 0x142   : > { %v1268_v30 = vsel %vm1266_vm10, %v1257_v11, %v1259_v14  ;;  %v1267_v33 = vsel %vm1266_vm10, %v1255_v15, %v1257_v11 }
 0x144   : > { %1543 = vmatpush1.bf16.msra.mxu0 %v1194_v16 }
 0x145   : > { %v1263_v18 = vpop.permute.xlu1 %1262  ;;  %v1265_v19 = vpop.permute.xlu0 %1264  ;;  %1544 = vmatprep.subr.bf16.mxu0 %v1214_v17 }
 0x146   : > { %v1270_v34 = vsel %vm1266_vm10, %v1263_v18, %v1265_v19 }
 0x148   : > { %1545 = vmatpush1.bf16.msra.mxu0 %v1213_v20 }
 0x149   : > { %v1261_v22 = vpop.permute.xlu1 %1260  ;;  %v1230_v23 = vpop.permute.xlu0 %1229  ;;  %1546 = vmatprep.subr.bf16.mxu0 %v1216_v21 }
 0x14a   : > { %v1241_v25 = vsel %vm1239_vm9, %v1230_v23, %v1232_v3  ;;  %v1240_v29 = vsel %vm1239_vm9, %v1228_v4, %v1230_v23  ;;  %v1269_v41 = vsel %vm1266_vm10, %v1261_v22, %v1263_v18  ;;  %v2411_v3 = vld [vmem:[%s2911_s3 + $0x60] ss:$12 sps:$4 sm:$0xff]   ;;  %v2413_v4 = vld [vmem:[%s2911_s3 + $0x7c] ss:$12 sps:$4 sm:$0xff]  }
 0x14c   : > { %1547 = vmatpush1.bf16.msra.mxu0 %v1215_v24 }
 0x14d   : > { %v1280_v26 = vpop.permute.xlu1 %1279  ;;  %v1278_v28 = vpop.permute.xlu0 %1277  ;;  %1548 = vmatprep.subr.bf16.mxu0 %v1241_v25 }
 0x14e   : > { %v1289_v42 = vsel %vm1287_vm11, %v1278_v28, %v1280_v26 }
 0x150   : > { %1549 = vmatpush1.bf16.msra.mxu0 %v1240_v29 }
 0x151   : > { %v1236_v32 = vpop.permute.xlu1 %1235  ;;  %v1276_v35 = vpop.permute.xlu0 %1275 }
 0x152   : > { %v1243_v36 = vsel %vm1239_vm9, %v1236_v32, %v1238_v6  ;;  %v1242_v37 = vsel %vm1239_vm9, %v1234_v10, %v1236_v32  ;;  %v1288_v47 = vsel %vm1287_vm11, %v1276_v35, %v1278_v28  ;;  %v2415_v6 = vld [vmem:[%s2911_s3 + $0x78] ss:$12 sps:$4 sm:$0xff]  }
 0x153   : > { %1550 = vmatprep.subr.bf16.mxu0 %v1243_v36 }
 0x154   : > { %1551 = vmatpush1.bf16.msra.mxu0 %v1242_v37 }
 0x155   : > { %v1303_v38 = vpop.permute.xlu1 %1302  ;;  %v1307_v31 = vpop.permute.xlu0 %1306  ;;  %1552 = vmatprep.subr.bf16.mxu0 %v1268_v30 }
 0x158   : > { %1553 = vmatpush1.bf16.msra.mxu0 %v1267_v33 }
 0x159   : > { %v1286_v39 = vpop.permute.xlu1 %1285  ;;  %v1284_v40 = vpop.permute.xlu0 %1283  ;;  %1554 = vmatprep.subr.bf16.mxu0 %v1270_v34 }
 0x15a   : > { %v1291_v48 = vsel %vm1287_vm11, %v1284_v40, %v1286_v39 }
 0x15c   : > { %1555 = vmatpush1.bf16.msra.mxu0 %v1269_v41 }
 0x15d   : > { %v1305_v43 = vpop.permute.xlu1 %1304  ;;  %v1282_v44 = vpop.permute.xlu0 %1281  ;;  %1556 = vmatprep.subr.bf16.mxu0 %v1289_v42 }
 0x15e   : > { %v1316_v45 = vsel %vm1314_vm12, %v1305_v43, %v1307_v31  ;;  %v1315_v46 = vsel %vm1314_vm12, %v1303_v38, %v1305_v43  ;;  %v1290_v52 = vsel %vm1287_vm11, %v1282_v44, %v1284_v40 }
 0x15f   : > { %1621 = vmatprep.subr.bf16.mxu1 %v1316_v45 }
 0x160   : > { %1557 = vmatpush1.bf16.msra.mxu0 %v1288_v47  ;;  %1622 = vmatpush1.bf16.msra.mxu1 %v1315_v46 }
 0x161   : > { %v1311_v49 = vpop.permute.xlu1 %1310  ;;  %v1313_v50 = vpop.permute.xlu0 %1312  ;;  %1558 = vmatprep.subr.bf16.mxu0 %v1291_v48 }
 0x162   : > { %v1318_v51 = vsel %vm1314_vm12, %v1311_v49, %v1313_v50 }
 0x163   : > { %1623 = vmatprep.subr.bf16.mxu1 %v1318_v51 }
 0x164   : > { %1559 = vmatpush1.bf16.msra.mxu0 %v1290_v52 }
 0x165   : > { %v1309_v55 = vpop.permute.xlu1 %1308 }
 0x166   : > { %v1317_v56 = vsel %vm1314_vm12, %v1309_v55, %v1311_v49 }
 0x167   : > { %1561 = vmatmul.mubr.bf16.vlgmr.msra.gmra.mrb[0].mxu0 %v2393_v53  ;;  %1624 = vmatpush1.bf16.msra.mxu1 %v1317_v56 }
 0x168   : > { %1570 = vmatprep.mubr.bf16.mxu0 %v2397_v54 }
 0x16a   : > { %2231 = vmatmul.mubr.msk.bf16.vlgmr.msra.gmra.mrb[0].mxu1 %vm1099_vm3, %v2396_v57 }
 0x16b   : > { %1663 = vmatprep.mubr.bf16.mxu1 %v2493_v27 }
 0x16f   : > { %1571 = vmatmul.mubr.bf16.gmra.mrb[4].mxu0 %v2399_v58 }
 0x170   : > { %1580 = vmatprep.mubr.bf16.mxu0 %v2401_v59 }
 0x172   : > { %2232 = vmatmul.mubr.msk.bf16.gmra.mrb[4].mxu1 %vm1099_vm3, %v2400_v60  ;;  %v1362_v8 = vpop.permute.xlu0 %1361 }
 0x173   : > { %1673 = vmatprep.mubr.bf16.mxu1 %v2493_v27 }
 0x176   : > { %v1367_v12 = vpop.permute.xlu1 %1366  ;;  %v1377_v38 = vpop.permute.xlu0 %1376 }
 0x177   : > { %1581 = vmatmul.mubr.bf16.gmra.mrb[8].mxu0 %v2403_v61 }
 0x178   : > { %1590 = vmatprep.mubr.bf16.mxu0 %v2405_v62 }
 0x17a   : > { %2233 = vmatmul.mubr.msk.bf16.gmra.mrb[8].mxu1 %vm1099_vm3, %v2404_v63  ;;  %v1372_v26 = vpop.permute.xlu1 %1371  ;;  %v1387_v59 = vpop.permute.xlu0 %1386 }
 0x17b   : > { %1683 = vmatprep.mubr.bf16.mxu1 %v2493_v27 }
 0x17e   : > { %v1382_v51 = vpop.permute.xlu1 %1381 }
 0x17f   : > { %1591 = vmatmul.mubr.bf16.gmra.mrb[12].mxu0 %v2407_v0 }
 0x180   : > { %1600 = vmatprep.mubr.bf16.mxu0 %v2409_v1 }
 0x182   : > { %2234 = vmatmul.mubr.msk.bf16.gmra.mrb[12].mxu1 %vm1099_vm3, %v2408_v2 }
 0x183   : > { %1693 = vmatprep.mubr.bf16.mxu1 %v2493_v27 }
 0x187   : > { %1601 = vmatmul.mubr.bf16.gmra.mrb[16].mxu0 %v2411_v3 }
 0x188   : > { %1610 = vmatprep.mubr.bf16.mxu0 %v2413_v4 }
 0x18a   : > { %2235 = vmatmul.mubr.msk.bf16.gmra.mrb[16].mxu1 %vm1099_vm3, %v2412_v5 }
 0x18b   : > { %1703 = vmatprep.mubr.bf16.mxu1 %v2493_v27 }
 0x18f   : > { %1611 = vmatmul.mubr.bf16.gmra.mrb[20].mxu0 %v2415_v6 }
 0x192   : > { %2236 = vmatmul.mubr.msk.bf16.gmra.mrb[20].mxu1 %vm1099_vm3, %v2416_v7 }
 0x193   : > { %1827 = vmatprep.mubr.bf16.mxu1 %v2493_v27 }
 0x23a   : > { %v1562_v9 = vpop.f32.mrb[0].mxu0 }
 0x23b   : > { %v1563_v10 = vadd.f32 %v1562_v9, %v1362_v8  ;;  %v1564_v11 = vpop.f32.mrb[1].mxu0 }
 0x23c   : > { %v1565_v13 = vadd.f32 %v1564_v11, %v1362_v8  ;;  %v1566_v14 = vpop.f32.mrb[2].mxu0  ;;  %v1392_v11 = vpop.permute.xlu1 %1391 }
 0x23d   : > { %v1567_v15 = vadd.f32 %v1566_v14, %v1367_v12  ;;  %v1568_v16 = vpop.f32.mrb[3].mxu0  ;;  %v1655_v17 = vpop.f32.mrb[0].mxu1 }
 0x23e   : > { %v1569_v18 = vadd.f32 %v1568_v16, %v1367_v12  ;;  %v1656_v19 = vadd.f32 %v1655_v17, %v1563_v10  ;;  %v1657_v20 = vpop.f32.mrb[1].mxu1 }
 0x23f   : > { %v1658_v21 = vadd.f32 %v1657_v20, %v1565_v13  ;;  %v1659_v22 = vpop.f32.mrb[2].mxu1 }
 0x240   : > { %v1660_v23 = vadd.f32 %v1659_v22, %v1567_v15  ;;  %v1661_v24 = vpop.f32.mrb[3].mxu1  ;;  %v1714_v28 = vmax.f32 %v1656_v19, 0.0  ;;  %v1397_v19 = vpop.permute.xlu0 %1396 }
 0x241   : > { %v1662_v25 = vadd.f32 %v1661_v24, %v1569_v18  ;;  %v1715_v35 = vmax.f32 %v1658_v21, 0.0 }
 0x242   : > { %v1716_v29 = vmax.f32 %v1660_v23, 0.0  ;;  %v1572_v32 = vpop.f32.mrb[4].mxu0 }
 0x243   : > { %v1717_v36 = vmax.f32 %v1662_v25, 0.0  ;;  %v1573_v37 = vadd.f32 %v1572_v32, %v1372_v26  ;;  %v1574_v30 = vpop.f32.mrb[5].mxu0 }
 0x244   : > { %v1738_v31 = vpack.c.bf16 %v1716_v29, %v1714_v28  ;;  %v1575_v33 = vadd.f32 %v1574_v30, %v1372_v26  ;;  %v1576_v34 = vpop.f32.mrb[6].mxu0 }
 0x245   : > { %v1739_v39 = vpack.c.bf16 %v1717_v36, %v1715_v35  ;;  %v1577_v40 = vadd.f32 %v1576_v34, %v1377_v38  ;;  %v1578_v41 = vpop.f32.mrb[7].mxu0  ;;  %v1665_v42 = vpop.f32.mrb[4].mxu1 }
 0x246   : > { %v1579_v43 = vadd.f32 %v1578_v41, %v1377_v38  ;;  %v1666_v44 = vadd.f32 %v1665_v42, %v1573_v37  ;;  %v1667_v45 = vpop.f32.mrb[5].mxu1 }
 0x247   : > { %v1668_v46 = vadd.f32 %v1667_v45, %v1575_v33  ;;  %v1669_v47 = vpop.f32.mrb[6].mxu1  ;;  %1795 = vmatprep.subr.bf16.mxu1 %v1739_v39 }
 0x248   : > { %v1670_v48 = vadd.f32 %v1669_v47, %v1577_v40  ;;  %v1671_v49 = vpop.f32.mrb[7].mxu1  ;;  %1796 = vmatpush1.bf16.msra.mxu1 %v1738_v31  ;;  %v1718_v52 = vmax.f32 %v1666_v44, 0.0  ;;  %v1402_v31 = vpop.permute.xlu1 %1401 }
 0x249   : > { %v1672_v50 = vadd.f32 %v1671_v49, %v1579_v43  ;;  %v1719_v55 = vmax.f32 %v1668_v46, 0.0  ;;  %v1407_v44 = vpop.permute.xlu0 %1406 }
 0x24a   : > { %v1720_v53 = vmax.f32 %v1670_v48, 0.0  ;;  %v1582_v54 = vpop.f32.mrb[8].mxu0 }
 0x24b   : > { %v1721_v56 = vmax.f32 %v1672_v50, 0.0  ;;  %v1583_v57 = vadd.f32 %v1582_v54, %v1382_v51  ;;  %v1584_v58 = vpop.f32.mrb[9].mxu0 }
 0x24c   : > { %v1740_v60 = vpack.c.bf16 %v1720_v53, %v1718_v52  ;;  %v1585_v61 = vadd.f32 %v1584_v58, %v1382_v51  ;;  %v1586_v62 = vpop.f32.mrb[10].mxu0 }
 0x24d   : > { %v1741_v63 = vpack.c.bf16 %v1721_v56, %v1719_v55  ;;  %v1587_v0 = vadd.f32 %v1586_v62, %v1387_v59  ;;  %v1588_v1 = vpop.f32.mrb[11].mxu0  ;;  %v1675_v2 = vpop.f32.mrb[8].mxu1 }
 0x24e   : > { %v1589_v3 = vadd.f32 %v1588_v1, %v1387_v59  ;;  %v1676_v4 = vadd.f32 %v1675_v2, %v1583_v57  ;;  %v1677_v5 = vpop.f32.mrb[9].mxu1 }
 0x24f   : > { %v1678_v6 = vadd.f32 %v1677_v5, %v1585_v61  ;;  %v1679_v7 = vpop.f32.mrb[10].mxu1  ;;  %1797 = vmatprep.subr.bf16.mxu1 %v1741_v63 }
 0x250   : > { %v1680_v8 = vadd.f32 %v1679_v7, %v1587_v0  ;;  %v1681_v9 = vpop.f32.mrb[11].mxu1  ;;  %1798 = vmatpush1.bf16.msra.mxu1 %v1740_v60  ;;  %v1722_v12 = vmax.f32 %v1676_v4, 0.0  ;;  %v1412_v60 = vpop.permute.xlu1 %1411 }
 0x251   : > { %v1682_v10 = vadd.f32 %v1681_v9, %v1589_v3  ;;  %v1723_v15 = vmax.f32 %v1678_v6, 0.0  ;;  %v1417_v4 = vpop.permute.xlu0 %1416 }
 0x252   : > { %v1724_v13 = vmax.f32 %v1680_v8, 0.0  ;;  %v1592_v14 = vpop.f32.mrb[12].mxu0 }
 0x253   : > { %v1725_v16 = vmax.f32 %v1682_v10, 0.0  ;;  %v1593_v17 = vadd.f32 %v1592_v14, %v1392_v11  ;;  %v1594_v18 = vpop.f32.mrb[13].mxu0 }
 0x254   : > { %v1742_v20 = vpack.c.bf16 %v1724_v13, %v1722_v12  ;;  %v1595_v21 = vadd.f32 %v1594_v18, %v1392_v11  ;;  %v1596_v22 = vpop.f32.mrb[14].mxu0 }
 0x255   : > { %v1743_v23 = vpack.c.bf16 %v1725_v16, %v1723_v15  ;;  %v1597_v24 = vadd.f32 %v1596_v22, %v1397_v19  ;;  %v1598_v25 = vpop.f32.mrb[15].mxu0  ;;  %v1685_v26 = vpop.f32.mrb[12].mxu1 }
 0x256   : > { %v1599_v28 = vadd.f32 %v1598_v25, %v1397_v19  ;;  %v1686_v29 = vadd.f32 %v1685_v26, %v1593_v17  ;;  %v1687_v32 = vpop.f32.mrb[13].mxu1  ;;  %v2417_v26 = vld [vmem:[%s2913_s5] sm:$0xff]  }
 0x257   : > { %v1688_v35 = vadd.f32 %v1687_v32, %v1595_v21  ;;  %v1689_v36 = vpop.f32.mrb[14].mxu1  ;;  %1799 = vmatprep.subr.bf16.mxu1 %v1743_v23 }
 0x258   : > { %v1690_v37 = vadd.f32 %v1689_v36, %v1597_v24  ;;  %v1691_v30 = vpop.f32.mrb[15].mxu1  ;;  %1800 = vmatpush1.bf16.msra.mxu1 %v1742_v20  ;;  %v1726_v33 = vmax.f32 %v1686_v29, 0.0  ;;  %v1761_v29 = vpop.permute.xlu0 %1760 }
 0x259   : > { %v1692_v38 = vadd.f32 %v1691_v30, %v1599_v28  ;;  %v1727_v40 = vmax.f32 %v1688_v35, 0.0  ;;  %v2418_v28 = vld [vmem:[%s2913_s5 + $0x8] sm:$0xff]  }
 0x25a   : > { %v1728_v34 = vmax.f32 %v1690_v37, 0.0  ;;  %v1602_v39 = vpop.f32.mrb[16].mxu0  ;;  %v1766_v37 = vpop.permute.xlu1 %1765 }
 0x25b   : > { %v1729_v41 = vmax.f32 %v1692_v38, 0.0  ;;  %v1603_v42 = vadd.f32 %v1602_v39, %v1402_v31  ;;  %v1604_v43 = vpop.f32.mrb[17].mxu0 }
 0x25c   : > { %v1744_v45 = vpack.c.bf16 %v1728_v34, %v1726_v33  ;;  %v1605_v46 = vadd.f32 %v1604_v43, %v1402_v31  ;;  %v1606_v47 = vpop.f32.mrb[18].mxu0  ;;  %v1776_v43 = vpop.permute.xlu0 %1775 }
 0x25d   : > { %v1745_v48 = vpack.c.bf16 %v1729_v41, %v1727_v40  ;;  %v1607_v49 = vadd.f32 %v1606_v47, %v1407_v44  ;;  %v1608_v50 = vpop.f32.mrb[19].mxu0  ;;  %v1695_v51 = vpop.f32.mrb[16].mxu1 }
 0x25e   : > { %v1609_v52 = vadd.f32 %v1608_v50, %v1407_v44  ;;  %v1696_v53 = vadd.f32 %v1695_v51, %v1603_v42  ;;  %v1697_v54 = vpop.f32.mrb[17].mxu1  ;;  %v1771_v39 = vpop.permute.xlu1 %1770 }
 0x25f   : > { %v1698_v55 = vadd.f32 %v1697_v54, %v1605_v46  ;;  %v1699_v56 = vpop.f32.mrb[18].mxu1  ;;  %1801 = vmatprep.subr.bf16.mxu1 %v1745_v48 }
 0x260   : > { %v1700_v57 = vadd.f32 %v1699_v56, %v1607_v49  ;;  %v1701_v58 = vpop.f32.mrb[19].mxu1  ;;  %1802 = vmatpush1.bf16.msra.mxu1 %v1744_v45  ;;  %v1730_v61 = vmax.f32 %v1696_v53, 0.0 }
 0x261   : > { %v1702_v59 = vadd.f32 %v1701_v58, %v1609_v52  ;;  %v1731_v0 = vmax.f32 %v1698_v55, 0.0 }
 0x262   : > { %v1732_v62 = vmax.f32 %v1700_v57, 0.0  ;;  %v1612_v63 = vpop.f32.mrb[20].mxu0 }
 0x263   : > { %v1733_v1 = vmax.f32 %v1702_v59, 0.0  ;;  %v1613_v2 = vadd.f32 %v1612_v63, %v1412_v60  ;;  %v1614_v3 = vpop.f32.mrb[21].mxu0 }
 0x264   : > { %v1746_v5 = vpack.c.bf16 %v1732_v62, %v1730_v61  ;;  %v1615_v6 = vadd.f32 %v1614_v3, %v1412_v60  ;;  %v1616_v7 = vpop.f32.mrb[22].mxu0 }
 0x265   : > { %v1747_v8 = vpack.c.bf16 %v1733_v1, %v1731_v0  ;;  %v1617_v9 = vadd.f32 %v1616_v7, %v1417_v4  ;;  %v1618_v10 = vpop.f32.mrb[23].mxu0  ;;  %v1705_v11 = vpop.f32.mrb[20].mxu1 }
 0x266   : > { %v1619_v12 = vadd.f32 %v1618_v10, %v1417_v4  ;;  %v1706_v13 = vadd.f32 %v1705_v11, %v1613_v2  ;;  %v1707_v14 = vpop.f32.mrb[21].mxu1 }
 0x267   : > { %v1708_v15 = vadd.f32 %v1707_v14, %v1615_v6  ;;  %v1709_v16 = vpop.f32.mrb[22].mxu1  ;;  %1803 = vmatprep.subr.bf16.mxu1 %v1747_v8 }
 0x268   : > { %v1710_v17 = vadd.f32 %v1709_v16, %v1617_v9  ;;  %v1711_v18 = vpop.f32.mrb[23].mxu1  ;;  %1804 = vmatpush1.bf16.msra.mxu1 %v1746_v5  ;;  %v1734_v20 = vmax.f32 %v1706_v13, 0.0 }
 0x269   : > { %v1712_v19 = vadd.f32 %v1711_v18, %v1619_v12  ;;  %v1735_v22 = vmax.f32 %v1708_v15, 0.0 }
 0x26a   : > { %v1736_v21 = vmax.f32 %v1710_v17, 0.0 }
 0x26b   : > { %v1737_v23 = vmax.f32 %v1712_v19, 0.0 }
 0x26c   : > { %v1748_v24 = vpack.c.bf16 %v1736_v21, %v1734_v20 }
 0x26d   : > { %v1749_v25 = vpack.c.bf16 %v1737_v23, %v1735_v22 }
 0x26f   : > { %1805 = vmatprep.subr.bf16.mxu1 %v1749_v25 }
 0x270   : > { %1806 = vmatpush1.bf16.msra.mxu1 %v1748_v24 }
 0x273   : > { %2239 = vmatmul.mubr.msk.bf16.vlgmr.msra.gmra.mrb[24].mxu1 %vm1266_vm10, %v2417_v26 }
 0x274   : > { %1837 = vmatprep.mubr.bf16.mxu1 %v2493_v27 }
 0x27b   : > { %2240 = vmatmul.mubr.msk.bf16.gmra.mrb[28].mxu1 %vm1266_vm10, %v2418_v28 }
 0x346   : > { %v1829_v32 = vpop.f32.mrb[24].mxu1 }
 0x347   : > { %v1830_v35 = vadd.f32 %v1829_v32, %v1761_v29  ;;  %v1831_v36 = vpop.f32.mrb[25].mxu1 }
 0x348   : > { %v1832_v30 = vadd.f32 %v1831_v36, %v1761_v29  ;;  %v1833_v27 = vpop.f32.mrb[26].mxu1 }
 0x349   : > { %1848 = vst [vmem:[%s927_s25] sm:$0x1f] %v1830_v35  ;;  %v1834_v38 = vadd.f32 %v1833_v27, %v1766_v37  ;;  %v1835_v31 = vpop.f32.mrb[27].mxu1 }
 0x34a   : > { %1849 = vst [vmem:[%s927_s25 + $0x8] sm:$0x1f] %v1832_v30  ;;  %v1836_v33 = vadd.f32 %v1835_v31, %v1766_v37 }
 0x34c   : > { %v1852_v34 = vcombine.low %v1834_v38, %v1836_v33 }
 0x34e   : > { %2241 = vst.sshfl [vmem:[%s937_s28] sm:$0x33 pattern:$0x76325410] %v1852_v34  ;;  %v1839_v40 = vpop.f32.mrb[28].mxu1 }
 0x34f   : > { %v1840_v41 = vadd.f32 %v1839_v40, %v1771_v39  ;;  %v1841_v42 = vpop.f32.mrb[29].mxu1 }
 0x350   : > { %v1842_v44 = vadd.f32 %v1841_v42, %v1771_v39  ;;  %v1843_v45 = vpop.f32.mrb[30].mxu1 }
 0x351   : > { %1862 = vst [vmem:[%s947_s19] sm:$0xff] %v1840_v41  ;;  %v1844_v46 = vadd.f32 %v1843_v45, %v1776_v43  ;;  %v1845_v47 = vpop.f32.mrb[31].mxu1 }
 0x352   : > { %1863 = vst [vmem:[%s947_s19 + $0x8] sm:$0xff] %v1842_v44  ;;  %v1846_v48 = vadd.f32 %v1845_v47, %v1776_v43 }
 0x353   : > { %1864 = vst [vmem:[%s947_s19 + $0x10] sm:$0xff] %v1844_v46 }
 0x354   : > { %1865 = vst [vmem:[%s947_s19 + $0x18] sm:$0xff] %v1846_v48 }
 0x355 PF: > { %s20_s13 = sadd.s32 1, %s2473_s13   ;;  %s2919_s30 = smov %s2461_s10 }
 0x356   : > { %p17_p11 = scmp.ge.s32.totalorder %s20_s13, 4   ;;  %s2920_s10 = smov %s2583_s18 }
 0x357   : > { %s2921_s11 = smov %s2469_s12  ;;  %s2922_s12 = smov %s2924_s14 }
 0x358   :  { %19 = sbr.rel (!%p17_p11) target bundleno = 3 (0x3), region = 287 }

</bundles_post_ra>
